<compile_context>
chip_gen: v5e
topology: v5e:2x2
jax: 0.10.0
libtpu: 0.0.40
codegen_flags: <defaults>
</compile_context>

<pallas_src>
import functools

import jax
import jax.numpy as jnp
from jax.experimental import pallas as pl
from jax.experimental.pallas import tpu as pltpu

LANE_CHOICES = (1024, 512, 256, 128)   # widest lane-dense last dim dividing n
FALLBACK_LANE = 128
TARGET_BLOCK_BYTES = 4 << 20           # ~4 MiB per block regardless of dtype
VMEM_LIMIT_BYTES = 40 << 20            # holds double-buffered in+out 4 MiB blocks


def _choose_layout(n, itemsize):
    """Pick (lane, rows, block_rows, needs_pad) for a flat tensor of n elems."""
    for lane in LANE_CHOICES:
        if n % lane == 0:
            needs_pad = False
            break
    else:
        lane = FALLBACK_LANE
        needs_pad = True
    rows = pl.cdiv(n, lane)
    # constant-byte blocks: bf16 gets 2x the rows of f32, int8 gets 4x
    target_rows = max(8, (TARGET_BLOCK_BYTES // (lane * int(itemsize))) // 8 * 8)
    block_rows = rows if rows <= target_rows else target_rows
    return lane, rows, block_rows, needs_pad


# --------------------------------------------------------------------------
# Kernel 1: global min / max reduction (scale initialization, 'max' method)
#   Each block is folded tile-aligned to (acc_rows, lane) and accumulated
#   elementwise into small VMEM scratch; single cross-lane reduce + SMEM
#   write only on the final grid step.
# --------------------------------------------------------------------------
def _minmax_kernel(x_ref, min_ref, max_ref, mn_acc, mx_acc, *, fold):
    i = pl.program_id(0)
    x = x_ref[...].astype(jnp.float32)

    @pl.when(i == 0)
    def _():
        mn_acc[...] = jnp.full_like(mn_acc, jnp.inf)
        mx_acc[...] = jnp.full_like(mx_acc, -jnp.inf)

    if fold > 1:
        acc_rows = mn_acc.shape[0]
        lane = x.shape[-1]
        # (block_rows, lane) -> (fold, acc_rows, lane): splits rows at the
        # sublane-tile boundary, so no VMEM copy is materialized.
        x3 = x.reshape(fold, acc_rows, lane)
        x_min = jnp.min(x3, axis=0)
        x_max = jnp.max(x3, axis=0)
    else:
        x_min = x
        x_max = x

    mn_acc[...] = jnp.minimum(mn_acc[...], x_min)
    mx_acc[...] = jnp.maximum(mx_acc[...], x_max)

    @pl.when(i == pl.num_programs(0) - 1)
    def _():
        min_ref[0, 0] = jnp.min(mn_acc[...])
        max_ref[0, 0] = jnp.max(mx_acc[...])


def _minmax_pallas(x):
    """Global (min, max) of x via a tiled Pallas reduction. Runs once at init."""
    flat = x.reshape(-1)
    n = flat.shape[0]
    lane, rows, block_rows, _ = _choose_layout(n, flat.dtype.itemsize)

    # The reduction must NOT see garbage from a ragged/partial block, so pad
    # to a whole number of blocks with a real data element (neutral for
    # min/max).  Init-only cost.
    num_blocks = pl.cdiv(rows, block_rows)
    padded_rows = num_blocks * block_rows
    padded = padded_rows * lane
    if padded > n:
        flat = jnp.concatenate(
            [flat, jnp.full((padded - n,), flat[0], flat.dtype)])
    x2d = flat.reshape(padded_rows, lane)

    acc_rows = 8 if block_rows % 8 == 0 else block_rows
    fold = block_rows // acc_rows

    xmin, xmax = pl.pallas_call(
        functools.partial(_minmax_kernel, fold=fold),
        out_shape=(
            jax.ShapeDtypeStruct((1, 1), jnp.float32),
            jax.ShapeDtypeStruct((1, 1), jnp.float32),
        ),
        grid_spec=pltpu.PrefetchScalarGridSpec(
            num_scalar_prefetch=0,
            grid=(num_blocks,),
            in_specs=[pl.BlockSpec((block_rows, lane), lambda i: (i, 0))],
            out_specs=(
                pl.BlockSpec(memory_space=pltpu.SMEM),
                pl.BlockSpec(memory_space=pltpu.SMEM),
            ),
            scratch_shapes=[
                pltpu.VMEM((acc_rows, lane), jnp.float32),
                pltpu.VMEM((acc_rows, lane), jnp.float32),
            ],
        ),
        compiler_params=pltpu.CompilerParams(
            dimension_semantics=("arbitrary",),
            vmem_limit_bytes=VMEM_LIMIT_BYTES),
    )(x2d)
    return xmin[0, 0], xmax[0, 0]


# --------------------------------------------------------------------------
# Kernel 2: elementwise uniform affine fake-quantization (the hot path)
#   round(x * inv_delta) + zp -> clamp -> x_quant * delta + (-zp*delta)
#   Params live in SMEM via scalar prefetch.
# --------------------------------------------------------------------------
def _quant_kernel(params_ref, x_ref, o_ref, *, n_levels):
    inv_delta = params_ref[0]       # 1 / (delta + eps), precomputed
    zp = params_ref[1]
    delta = params_ref[2]
    neg_zp_delta = params_ref[3]    # -zp * delta, precomputed (saves a VALU op)
    x = x_ref[...].astype(jnp.float32)
    # round_ste reduces to plain round in the forward pass
    x_int = jnp.round(x * inv_delta) + zp
    x_quant = jnp.clip(x_int, 0.0, float(n_levels - 1))
    o_ref[...] = (x_quant * delta + neg_zp_delta).astype(o_ref.dtype)


@functools.partial(jax.jit, static_argnames=("n_levels", "eps"))
def _quantize_pallas(x, delta, zero_point, *, n_levels, eps=1e-8):
    orig_shape = x.shape
    orig_dtype = x.dtype
    n = x.size
    lane, rows, block_rows, needs_pad = _choose_layout(n, x.dtype.itemsize)

    flat = x.reshape(-1)                      # no dtype staging pass
    if needs_pad:
        # rare fallback: no lane width in LANE_CHOICES divides n
        flat = jnp.pad(flat, (0, rows * lane - n))
    x2d = flat.reshape(rows, lane)

    delta_f = jnp.asarray(delta, jnp.float32)
    zp_f = jnp.asarray(zero_point, jnp.float32)
    # NOTE: BRECQ divides by (delta + eps) in the forward; multiply-by-
    # reciprocal matches up to FP tie-breaking (delta is clamped >= 1e-8).
    inv_delta = jnp.float32(1.0) / (delta_f + jnp.float32(eps))
    params = jnp.stack([inv_delta, zp_f, delta_f, -zp_f * delta_f])

    grid = pl.cdiv(rows, block_rows)          # ragged last block: OOB writes dropped
    out2d = pl.pallas_call(
        functools.partial(_quant_kernel, n_levels=n_levels),
        out_shape=jax.ShapeDtypeStruct((rows, lane), orig_dtype),
        grid_spec=pltpu.PrefetchScalarGridSpec(
            num_scalar_prefetch=1,            # params land in SMEM
            grid=(grid,),
            in_specs=[pl.BlockSpec((block_rows, lane), lambda i, p: (i, 0))],
            out_specs=pl.BlockSpec((block_rows, lane), lambda i, p: (i, 0)),
        ),
        compiler_params=pltpu.CompilerParams(
            dimension_semantics=("parallel",),
            vmem_limit_bytes=VMEM_LIMIT_BYTES),
    )(params, x2d)

    if needs_pad:
        return out2d.reshape(-1)[:n].reshape(orig_shape)
    return out2d.reshape(orig_shape)


# --------------------------------------------------------------------------
# Module-equivalent wrapper (glue / parameter setup in plain Python/JAX)
# --------------------------------------------------------------------------
class UniformAffineQuantizer:
    def __init__(self, n_bits=8, symmetric=False, channel_wise=False,
                 scale_method='max', leaf_param=False):
        assert 2 <= n_bits <= 8, 'bitwidth not supported'
        self.sym = symmetric
        self.n_bits = n_bits
        self.n_levels = 2 ** n_bits
        self.delta = None
        self.zero_point = None
        self.inited = False
        self.leaf_param = leaf_param
        self.channel_wise = channel_wise
        self.scale_method = scale_method

    def init_quantization_scale(self, x, channel_wise=False, eps=1e-8):
        if channel_wise:
            # TODO(synk): channel_wise init (per-channel host loop) not implemented;
            # default BRECQ activation-quantizer config is channel_wise=False.
            raise NotImplementedError
        if 'max' in self.scale_method:
            xmin, xmax = _minmax_pallas(x)
            x_min = min(float(xmin), 0.0)   # one-time host syncs (init only)
            x_max = max(float(xmax), 0.0)
            if 'scale' in self.scale_method:
                x_min = x_min * (self.n_bits + 2) / 8
                x_max = x_max * (self.n_bits + 2) / 8
            x_absmax = max(abs(x_min), x_max)
            if self.sym:
                x_min, x_max = (-x_absmax if x_min < 0 else 0.0, x_absmax)
            delta = float(x_max - x_min) / (self.n_levels - 1)
            if delta < 1e-8:
                delta = 1e-8
            zero_point = round(-x_min / delta)   # half-to-even, like torch.round
            return float(delta), float(zero_point)
        elif self.scale_method == 'mse':
            # TODO(synk): 'mse' search (80-step scalar loop over the minmax/quant
            # kernels + lp_loss) not implemented.
            raise NotImplementedError
        else:
            raise NotImplementedError

    def __call__(self, x, eps=1e-8):
        if not self.inited:
            self.delta, self.zero_point = self.init_quantization_scale(
                x, self.channel_wise)
            self.inited = True
        return _quantize_pallas(x, self.delta, self.zero_point,
                                n_levels=self.n_levels, eps=eps)


# pure-JAX reference for verification.
# Mirrors BRECQ's forward: round(x/(delta+eps)) (as x * 1/(delta+eps)),
# clamp, (x_quant - zp) * delta.  The kernel's fused x_quant*delta - zp*delta
# differs by at most a couple of f32 ulps.
def _reference(x, delta, zero_point, n_levels, eps=1e-8):
    inv = jnp.float32(1.0) / (jnp.float32(delta) + jnp.float32(eps))
    x_int = jnp.round(x.astype(jnp.float32) * inv) + jnp.float32(zero_point)
    x_quant = jnp.clip(x_int, 0.0, float(n_levels - 1))
    return ((x_quant - jnp.float32(zero_point)) * jnp.float32(delta)).astype(x.dtype)


if __name__ == "__main__":
    key = jax.random.PRNGKey(0)
    k1, k2 = jax.random.split(key)

    # activation-like NCHW input, matching the PyTorch convention
    x = jax.random.normal(k1, (2, 4, 16, 16), dtype=jnp.float32) * 3.0
    quant = UniformAffineQuantizer(n_bits=8, symmetric=False,
                                   channel_wise=False, scale_method='max')
    y = jax.block_until_ready(quant(x))    # first call: min/max init + quant kernel
    y2 = jax.block_until_ready(quant(x))   # steady-state hot path (jitted, no init)

    y_ref = _reference(x, quant.delta, quant.zero_point, quant.n_levels)
    assert y.shape == x.shape and y.dtype == x.dtype
    assert float(jnp.max(jnp.abs(y - y_ref))) < 1e-5, "mismatch vs reference"
    assert float(jnp.max(jnp.abs(y2 - y_ref))) < 1e-5, "mismatch vs reference"

    # non-lane-aligned size: exercises the padded-fallback path
    x_odd = jax.random.normal(k2, (2, 3, 5, 7), dtype=jnp.float32) * 1.5
    quant_odd = UniformAffineQuantizer(n_bits=8)
    y_odd = jax.block_until_ready(quant_odd(x_odd))
    y_odd_ref = _reference(x_odd, quant_odd.delta, quant_odd.zero_point,
                           quant_odd.n_levels)
    assert y_odd.shape == x_odd.shape and y_odd.dtype == x_odd.dtype
    assert float(jnp.max(jnp.abs(y_odd - y_odd_ref))) < 1e-5, "mismatch (odd shape)"

    print("KERNEL_OK")
</pallas_src>

<mosaic_0001>
module attributes {stable_mosaic.version = 11 : i64} {
  func.func @_minmax_kernel(%arg0: i32, %arg1: memref<2x1024xf32, #tpu.memory_space<vmem>>, %arg2: memref<1x1xf32, #tpu.memory_space<smem>>, %arg3: memref<1x1xf32, #tpu.memory_space<smem>>, %arg4: memref<2x1024xf32, #tpu.memory_space<vmem>>, %arg5: memref<2x1024xf32, #tpu.memory_space<vmem>>) attributes {dimension_semantics = [#tpu.dimension_semantics<arbitrary>], iteration_bounds = array<i64: 1>, scalar_prefetch = 0 : i64, scratch_operands = 2 : i64, tpu.core_type = #tpu.core_type<tc>, window_params = [{transform_indices = @transform_0, window_bounds = array<i64: 2, 1024>}, {transform_indices = @transform_1, window_bounds = array<i64: 1, 1>}, {transform_indices = @transform_2, window_bounds = array<i64: 1, 1>}]} {
    %c0 = arith.constant 0 : index
    %c0_0 = arith.constant 0 : index
    %0 = vector.load %arg1[%c0, %c0_0] : memref<2x1024xf32, #tpu.memory_space<vmem>>, vector<2x1024xf32>
    %c0_i32 = arith.constant 0 : i32
    %1 = arith.cmpi eq, %arg0, %c0_i32 : i32
    %2 = arith.extui %1 : i1 to i32
    %c0_i32_1 = arith.constant 0 : i32
    %3 = arith.cmpi ne, %2, %c0_i32_1 : i32
    scf.if %3 {
      %cst = arith.constant 0x7F800000 : f32
      %13 = vector.broadcast %cst : f32 to vector<2x1024xf32>
      %c0_12 = arith.constant 0 : index
      %c0_13 = arith.constant 0 : index
      %14 = vector.load %arg4[%c0_12, %c0_13] : memref<2x1024xf32, #tpu.memory_space<vmem>>, vector<2x1024xf32>
      tpu.vector_store %arg4[%c0_12, %c0_13], %13 {strides = array<i32>} : memref<2x1024xf32, #tpu.memory_space<vmem>>, vector<2x1024xf32>,
      %cst_14 = arith.constant 0xFF800000 : f32
      %15 = vector.broadcast %cst_14 : f32 to vector<2x1024xf32>
      %c0_15 = arith.constant 0 : index
      %c0_16 = arith.constant 0 : index
      %16 = vector.load %arg5[%c0_15, %c0_16] : memref<2x1024xf32, #tpu.memory_space<vmem>>, vector<2x1024xf32>
      tpu.vector_store %arg5[%c0_15, %c0_16], %15 {strides = array<i32>} : memref<2x1024xf32, #tpu.memory_space<vmem>>, vector<2x1024xf32>,
    } else {
    }
    %c0_2 = arith.constant 0 : index
    %c0_3 = arith.constant 0 : index
    %4 = vector.load %arg4[%c0_2, %c0_3] : memref<2x1024xf32, #tpu.memory_space<vmem>>, vector<2x1024xf32>
    %5 = arith.minimumf %4, %0 : vector<2x1024xf32>
    %c0_4 = arith.constant 0 : index
    %c0_5 = arith.constant 0 : index
    %6 = vector.load %arg4[%c0_4, %c0_5] : memref<2x1024xf32, #tpu.memory_space<vmem>>, vector<2x1024xf32>
    tpu.vector_store %arg4[%c0_4, %c0_5], %5 {strides = array<i32>} : memref<2x1024xf32, #tpu.memory_space<vmem>>, vector<2x1024xf32>,
    %c0_6 = arith.constant 0 : index
    %c0_7 = arith.constant 0 : index
    %7 = vector.load %arg5[%c0_6, %c0_7] : memref<2x1024xf32, #tpu.memory_space<vmem>>, vector<2x1024xf32>
    %8 = arith.maximumf %7, %0 : vector<2x1024xf32>
    %c0_8 = arith.constant 0 : index
    %c0_9 = arith.constant 0 : index
    %9 = vector.load %arg5[%c0_8, %c0_9] : memref<2x1024xf32, #tpu.memory_space<vmem>>, vector<2x1024xf32>
    tpu.vector_store %arg5[%c0_8, %c0_9], %8 {strides = array<i32>} : memref<2x1024xf32, #tpu.memory_space<vmem>>, vector<2x1024xf32>,
    %c0_i32_10 = arith.constant 0 : i32
    %10 = arith.cmpi eq, %arg0, %c0_i32_10 : i32
    %11 = arith.extui %10 : i1 to i32
    %c0_i32_11 = arith.constant 0 : i32
    %12 = arith.cmpi ne, %11, %c0_i32_11 : i32
    scf.if %12 {
      %c0_12 = arith.constant 0 : index
      %c0_13 = arith.constant 0 : index
      %13 = vector.load %arg4[%c0_12, %c0_13] : memref<2x1024xf32, #tpu.memory_space<vmem>>, vector<2x1024xf32>
      %14 = vector.shape_cast %13 : vector<2x1024xf32> to vector<1x2x1024xf32>
      %cst = arith.constant dense<0x7F800000> : vector<1xf32>
      %15 = vector.multi_reduction <minimumf>, %14, %cst [1, 2] : vector<1x2x1024xf32> to vector<1xf32>
      %16 = vector.shape_cast %15 : vector<1xf32> to vector<1x1x1xf32>
      %17 = vector.extract %16[0, 0, 0] : f32 from vector<1x1x1xf32>
      %c0_14 = arith.constant 0 : index
      %c0_15 = arith.constant 0 : index
      %18 = memref.load %arg2[%c0_14, %c0_15] : memref<1x1xf32, #tpu.memory_space<smem>>
      memref.store %17, %arg2[%c0_14, %c0_15] : memref<1x1xf32, #tpu.memory_space<smem>>
      %c0_16 = arith.constant 0 : index
      %c0_17 = arith.constant 0 : index
      %19 = vector.load %arg5[%c0_16, %c0_17] : memref<2x1024xf32, #tpu.memory_space<vmem>>, vector<2x1024xf32>
      %20 = vector.shape_cast %19 : vector<2x1024xf32> to vector<1x2x1024xf32>
      %cst_18 = arith.constant dense<0xFF800000> : vector<1xf32>
      %21 = vector.multi_reduction <maximumf>, %20, %cst_18 [1, 2] : vector<1x2x1024xf32> to vector<1xf32>
      %22 = vector.shape_cast %21 : vector<1xf32> to vector<1x1x1xf32>
      %23 = vector.extract %22[0, 0, 0] : f32 from vector<1x1x1xf32>
      %c0_19 = arith.constant 0 : index
      %c0_20 = arith.constant 0 : index
      %24 = memref.load %arg3[%c0_19, %c0_20] : memref<1x1xf32, #tpu.memory_space<smem>>
      memref.store %23, %arg3[%c0_19, %c0_20] : memref<1x1xf32, #tpu.memory_space<smem>>
    } else {
    }
    return
  }
  func.func @transform_0(%arg0: i32) -> (i32, i32) {
    %c0_i32 = arith.constant 0 : i32
    %c0_i32_0 = arith.constant 0 : i32
    return %arg0, %c0_i32 : i32, i32
  }
  func.func @transform_1(%arg0: i32) -> (i32, i32) {
    %c0_i32 = arith.constant 0 : i32
    %c0_i32_0 = arith.constant 0 : i32
    %c0_i32_1 = arith.constant 0 : i32
    return %c0_i32, %c0_i32_0 : i32, i32
  }
  func.func @transform_2(%arg0: i32) -> (i32, i32) {
    %c0_i32 = arith.constant 0 : i32
    %c0_i32_0 = arith.constant 0 : i32
    %c0_i32_1 = arith.constant 0 : i32
    return %c0_i32, %c0_i32_0 : i32, i32
  }
}

</mosaic_0001>

<bundles_post_ra>
// kernel: tpu_custom_call.1
= control target key start
LH: loop header
LB: loop body
LE: loop exit
PB: predicated region body
PF: predicated region fallthrough
CT: control target
= control target key end

     0   :  { %8 = vsyncpa [#allocation5], 0  ;;  %s284_s0 = inlined_call_operand.hbm [shape: f32[2,1024], index: 0, kind: input, shape index: {}]   ;;  %s285_s1 = inlined_call_operand.hbm [shape: f32[1,1], index: 1, kind: output, shape index: {0}]   ;;  %s286_s2 = inlined_call_operand.hbm [shape: f32[1,1], index: 2, kind: output, shape index: {1}]  }
   0x1   :  { %9 = vsyncpa [#allocation6], 0 }
   0x2   :  { %10 = vsyncpa [#allocation9], 0  ;;  %s16_s11 = sshll.u32 %s284_s0, 4  ;;  %s241_s12 = smov [#allocation4]   ;;  %s17_s11 = int_to_ptr.hbm [resolvable:$true] %s16_s11 }
   0x3   :  { %s18_s13 = sshll.u32 %s241_s12, 4  ;;  %s19_s13 = int_to_ptr.vmem [resolvable:$true] %s18_s13 }
   0x4   :  { %21 = dma.hbm_to_vmem [thread:$0]  %s17_s11, 256, %s19_s13, [#allocation5]  }
   0x5   :  { %235 = dma.done.wait [#allocation5], 256  }
   0x6   :  { %236 = vsyncadd [#allocation5], 4294967040  ;;  %v26_v0 = vld [vmem:[#allocation4] sm:$0xff]  ;;  %v27_v1 = vld [vmem:[#allocation4 + $0x8] sm:$0xff]  ;;  %vm74_vm0 = vcmask 1041408   ;;  %s155_s15 = sshll.u32 %s285_s1, 4  ;;  %s156_s15 = int_to_ptr.hbm [resolvable:$true] %s155_s15 }
   0x7   :  { %55 = vst [vmem:[#allocation1] ss:$4 sm:$0xff] %v26_v0  ;;  %s242_s17 = smov [#allocation7]   ;;  %s164_s20 = sshll.u32 %s286_s2, 4  ;;  %s165_s20 = int_to_ptr.hbm [resolvable:$true] %s164_s20 }
   0x8   :  { %57 = vst [vmem:[#allocation1 + $0x20] ss:$4 sm:$0xff] %v27_v1  ;;  %s243_s22 = smov [#allocation8]  }
   0xe   :  { %v58_v2 = vld.sshfl [vmem:[#allocation1] sm:$0xff pattern:$0x73625140]  ;;  %v59_v3 = vld.sshfl [vmem:[#allocation1 + $0x8] sm:$0xff pattern:$0x73625140] }
   0xf   :  { %v60_v4 = vld.sshfl [vmem:[#allocation1 + $0x10] sm:$0xff pattern:$0x73625140]  ;;  %v61_v5 = vld.sshfl [vmem:[#allocation1 + $0x18] sm:$0xff pattern:$0x73625140] }
  0x10   :  { %v62_v6 = vld.sshfl [vmem:[#allocation1 + $0x20] sm:$0xff pattern:$0x73625140]  ;;  %v63_v7 = vld.sshfl [vmem:[#allocation1 + $0x28] sm:$0xff pattern:$0x73625140] }
  0x11   :  { %v64_v8 = vld.sshfl [vmem:[#allocation1 + $0x30] sm:$0xff pattern:$0x73625140]  ;;  %v65_v9 = vld.sshfl [vmem:[#allocation1 + $0x38] sm:$0xff pattern:$0x73625140] }
  0x12   :  { %v75_v10 = vsel %vm74_vm0, %v58_v2, inf  ;;  %v76_v11 = vsel %vm74_vm0, %v59_v3, inf  ;;  %v77_v12 = vsel %vm74_vm0, %v60_v4, inf  ;;  %v78_v13 = vsel %vm74_vm0, %v61_v5, inf  ;;  %105 = vst [vmem:[#allocation1] ss:$4 sm:$0xff] %v26_v0 }
  0x13   :  { %v79_v14 = vsel %vm74_vm0, %v62_v6, inf  ;;  %v81_v15 = vsel %vm74_vm0, %v63_v7, inf  ;;  %v83_v16 = vsel %vm74_vm0, %v64_v8, inf  ;;  %v85_v17 = vsel %vm74_vm0, %v65_v9, inf  ;;  %107 = vst [vmem:[#allocation1 + $0x20] ss:$4 sm:$0xff] %v27_v1 }
  0x14   :  { %v80_v18 = vmin.f32 %v75_v10, %v79_v14  ;;  %v82_v19 = vmin.f32 %v76_v11, %v81_v15  ;;  %v84_v20 = vmin.f32 %v77_v12, %v83_v16  ;;  %v86_v21 = vmin.f32 %v78_v13, %v85_v17 }
  0x16   :  { %v87_v22 = vmin.f32 %v80_v18, %v82_v19  ;;  %v88_v23 = vmin.f32 %v84_v20, %v86_v21 }
  0x18   :  { %v89_v24 = vmin.f32 %v87_v22, %v88_v23 }
  0x19   :  { %v108_v25 = vld.sshfl [vmem:[#allocation1] sm:$0xff pattern:$0x73625140]  ;;  %v109_v26 = vld.sshfl [vmem:[#allocation1 + $0x8] sm:$0xff pattern:$0x73625140] }
  0x1a   :  { %90 = vmin.xlane.f32.xlu0 %v89_v24  ;;  %v110_v27 = vld.sshfl [vmem:[#allocation1 + $0x10] sm:$0xff pattern:$0x73625140]  ;;  %v111_v28 = vld.sshfl [vmem:[#allocation1 + $0x18] sm:$0xff pattern:$0x73625140] }
  0x1b   :  { %v112_v29 = vld.sshfl [vmem:[#allocation1 + $0x20] sm:$0xff pattern:$0x73625140]  ;;  %v113_v30 = vld.sshfl [vmem:[#allocation1 + $0x28] sm:$0xff pattern:$0x73625140] }
  0x1c   :  { %v114_v31 = vld.sshfl [vmem:[#allocation1 + $0x30] sm:$0xff pattern:$0x73625140]  ;;  %v115_v32 = vld.sshfl [vmem:[#allocation1 + $0x38] sm:$0xff pattern:$0x73625140] }
  0x1d   :  { %v124_v33 = vsel %vm74_vm0, %v108_v25, -inf  ;;  %v125_v34 = vsel %vm74_vm0, %v109_v26, -inf  ;;  %v126_v35 = vsel %vm74_vm0, %v110_v27, -inf  ;;  %v127_v36 = vsel %vm74_vm0, %v111_v28, -inf }
  0x1e   :  { %v128_v37 = vsel %vm74_vm0, %v112_v29, -inf  ;;  %v130_v38 = vsel %vm74_vm0, %v113_v30, -inf  ;;  %v132_v39 = vsel %vm74_vm0, %v114_v31, -inf  ;;  %v134_v40 = vsel %vm74_vm0, %v115_v32, -inf }
  0x1f   :  { %v129_v41 = vmax.f32 %v124_v33, %v128_v37  ;;  %v131_v42 = vmax.f32 %v125_v34, %v130_v38  ;;  %v133_v43 = vmax.f32 %v126_v35, %v132_v39  ;;  %v135_v44 = vmax.f32 %v127_v36, %v134_v40 }
  0x21   :  { %v136_v45 = vmax.f32 %v129_v41, %v131_v42  ;;  %v137_v46 = vmax.f32 %v133_v43, %v135_v44 }
  0x23   :  { %v138_v47 = vmax.f32 %v136_v45, %v137_v46 }
  0x25   :  { %139 = vmax.xlane.f32.xlu0 %v138_v47 }
  0x8d   :  { %v91_v48 = vpop.xlane.xlu0 %90 }
  0x8e   :  { %v92_v49 = vrot.slane %v91_v48, 4 }
  0x90   :  { %v93_v50 = vmin.f32 %v91_v48, %v92_v49 }
  0x92   :  { %v94_v51 = vrot.slane %v93_v50, 2 }
  0x94   :  { %v95_v52 = vmin.f32 %v93_v50, %v94_v51 }
  0x96   :  { %v96_v53 = vrot.slane %v95_v52, 1 }
  0x98   :  { %v140_v54 = vpop.xlane.xlu0 %139  ;;  %v97_v55 = vmin.f32 %v95_v52, %v96_v53 }
  0x99   :  { %v141_v56 = vrot.slane %v140_v54, 4 }
  0x9a   :  { %180 = vpush %v97_v55 }
  0x9b   :  { %v142_v57 = vmax.f32 %v140_v54, %v141_v56 }
  0x9d   :  { %v143_v58 = vrot.slane %v142_v57, 2 }
  0x9f   :  { %v144_v59 = vmax.f32 %v142_v57, %v143_v58 }
  0xa1   :  { %v145_v60 = vrot.slane %v144_v59, 1 }
  0xa3   :  { %v146_v61 = vmax.f32 %v144_v59, %v145_v60 }
  0xa5   :  { %182 = vpush %v146_v61 }
  0xcb   :  { %s181_s16 = spop %180 }
  0xcc   :  { %100 = sst [smem:[#allocation7]] %s181_s16 }
  0xcd   :  { %158 = dma.smem_to_hbm %s242_s17, 16, %s156_s15, [#allocation6]  }
  0xd6   :  { %s183_s21 = spop %182 }
  0xd7   :  { %149 = sst [smem:[#allocation8]] %s183_s21 }
  0xd8   :  { %167 = dma.smem_to_hbm %s243_s22, 16, %s165_s20, [#allocation9]  }
  0xd9   :  { %237 = dma.done.wait [#allocation6], 16  }
  0xda   :  { %238 = vsyncadd [#allocation6], 4294967280 }
  0xdb   :  { %239 = dma.done.wait [#allocation9], 16  }
  0xdc   :  { %240 = vsyncadd [#allocation9], 4294967280 }
  0xdd   :  { %176 = sfence }
  0xde   :  { %177 = vsyncpa [#allocation5], 1 }
  0xdf   :  { %178 = vsyncpa [#allocation6], 1 }
  0xe0   :  { %179 = vsyncpa [#allocation9], 1 }

</bundles_post_ra>
